<compile_context>
chip_gen: v7x
topology: tpu7x:2x2x1
jax: 0.10.0
libtpu: 0.0.40
codegen_flags: <defaults>
</compile_context>

<pallas_src>
import functools

import jax
import jax.numpy as jnp
from jax.experimental import pallas as pl
from jax.experimental.pallas import tpu as pltpu


_VMEM = pl.BlockSpec(memory_space=pltpu.MemorySpace.VMEM)


def _scalar_out():
    return jax.ShapeDtypeStruct((1, 1), jnp.float32)


@functools.lru_cache(maxsize=1)
def _tpu_vmem_capacity_bytes():
    """Physical VMEM per core (128 MiB on v5e/v6e, 64 MiB on v7x)."""
    try:
        info = pltpu.get_tpu_info()
        cap = getattr(info, "vmem_capacity_bytes", None)
        if cap:
            return int(cap)
    except Exception:
        pass
    # Conservative fallback (v7x-sized) so tile/limit choices are always legal.
    return 64 << 20


def _choose_row_tile(n, c, itemsize, budget_bytes, cap=2048):
    """Pick a row-tile that keeps one (TILE_N, C) native-dtype buffer under
    `budget_bytes`.  Multiple of 8 (sublane constraint) unless the whole array
    is tiny, in which case the block equals the full array dims (always legal)."""
    if n <= 8:
        return n
    rows = budget_bytes // max(1, c * itemsize)
    rows = max(8, min(cap, rows, n))
    rows = (rows // 8) * 8
    return max(8, rows)


def _xe_vmem_limit_bytes(tile_n, c, itemsize, vmem_cap):
    """2x native tile (double buffer) + ~3x f32 upcast/exp temporaries + headroom."""
    tile_native = tile_n * c * itemsize
    tile_f32 = tile_n * c * 4
    need = 2 * tile_native + 3 * tile_f32 + 4 * tile_n * 4 + (4 << 20)
    need = max(need, 32 << 20)
    return int(min(need, (vmem_cap * 3) // 4))


# ---------------------------------------------------------------------------
# Kernel 1: row-tiled masked cross-entropy (ignore_index = -1 semantics)
#   logits: (N, C) native float dtype, targets: (N, 1) i32
#   Grid: (num_cores, row_blocks_per_core).  Each "core" grid slot produces its
#   own partial (loss_sum, count); the wrapper sums partials and divides.
# ---------------------------------------------------------------------------
def _masked_xe_tiled_kernel(n_rows, blocks_per_core,
                            logits_ref, targets_ref,
                            loss_out_ref, cnt_out_ref,
                            loss_acc, cnt_acc):
    core = pl.program_id(0)
    step = pl.program_id(1)

    @pl.when(step == 0)
    def _():
        loss_acc[...] = jnp.zeros_like(loss_acc)
        cnt_acc[...] = jnp.zeros_like(cnt_acc)

    logits_nat = logits_ref[...]                      # (TILE_N, C) native dtype
    tgt = targets_ref[...]                            # (TILE_N, 1) i32
    tn, c = logits_nat.shape

    # Logical (unclamped) block id -> global row indices.  Rows past n_rows
    # (partial last tile / clamped duplicate tile) are masked out here; their
    # VMEM contents may be garbage but are only touched under jnp.where.
    blk = core * blocks_per_core + step
    row_idx = blk * tn + jax.lax.broadcasted_iota(jnp.int32, (tn, 1), 0)
    valid = jnp.logical_and(row_idx < n_rows, tgt >= 0)         # (TILE_N, 1)

    # One-hot pick on the NATIVE dtype (exact, only one non-zero per row);
    # saves f32 vregs/VALU ops when inputs are bf16.
    # TODO(synk): no guard for targets >= C (matches undefined torch behavior).
    cols = jax.lax.broadcasted_iota(jnp.int32, (tn, c), 1)
    picked = jnp.sum(
        jnp.where(cols == tgt, logits_nat, jnp.zeros((), logits_nat.dtype)),
        axis=-1, keepdims=True).astype(jnp.float32)             # (TILE_N, 1)

    logits = logits_nat.astype(jnp.float32)
    m = jnp.max(logits, axis=-1, keepdims=True)
    lse = m + jnp.log(jnp.sum(jnp.exp(logits - m), axis=-1, keepdims=True))

    loss_acc[...] += jnp.sum(jnp.where(valid, lse - picked, 0.0),
                             axis=(0, 1), keepdims=True)
    cnt_acc[...] += jnp.sum(valid.astype(jnp.float32), axis=(0, 1), keepdims=True)

    @pl.when(step == pl.num_programs(1) - 1)
    def _():
        loss_out_ref[...] = loss_acc[...].reshape(1, 1, 1)
        cnt_out_ref[...] = cnt_acc[...].reshape(1, 1, 1)


def masked_cross_entropy(logits, targets, *, row_tile=None):
    """logits (N, C) float (native dtype), targets (N,) int.
    CrossEntropy(ignore_index=-1, reduction='mean'); 0.0 if no valid row."""
    n, c = logits.shape
    targets2d = targets.astype(jnp.int32).reshape(n, 1)
    itemsize = jnp.dtype(logits.dtype).itemsize
    vmem_cap = _tpu_vmem_capacity_bytes()
    # Bigger tiles on 128-MiB parts (v5e/v6e); 4 MiB/buffer on 64-MiB v7x so
    # double-buffer + f32 temporaries stay well inside VMEM.
    budget = (8 << 20) if vmem_cap > (96 << 20) else (4 << 20)
    tile_n = row_tile if row_tile is not None else _choose_row_tile(
        n, c, itemsize, budget_bytes=budget, cap=2048)

    num_row_blocks = pl.cdiv(n, tile_n)
    num_cores = 2 if num_row_blocks >= 2 else 1     # v7x: 2 TCs; elsewhere a no-op
    blocks_per_core = pl.cdiv(num_row_blocks, num_cores)

    def in_map(core, step):
        blk = core * blocks_per_core + step
        # Clamp the (at most one) overhanging block; its rows are masked out in
        # the kernel via row_idx >= n_rows, so it contributes exactly zero.
        return (jnp.minimum(blk, num_row_blocks - 1), 0)

    kernel = functools.partial(_masked_xe_tiled_kernel, n, blocks_per_core)
    cost = pl.CostEstimate(
        flops=int(6 * n * c),
        transcendentals=int(n * c),
        bytes_accessed=int(n * c * itemsize + n * 4 + 2 * num_cores * 4))

    # TODO(synk): for very large vocab (>64k) add a vocab grid axis with an
    # online-LSE accumulator so the tile becomes (TILE_N, TILE_C) not (TILE_N, V).
    loss_parts, cnt_parts = pl.pallas_call(
        kernel,
        out_shape=(jax.ShapeDtypeStruct((num_cores, 1, 1), jnp.float32),
                   jax.ShapeDtypeStruct((num_cores, 1, 1), jnp.float32)),
        grid_spec=pltpu.PrefetchScalarGridSpec(
            num_scalar_prefetch=0,
            grid=(num_cores, blocks_per_core),
            in_specs=[
                pl.BlockSpec((tile_n, c), in_map),
                pl.BlockSpec((tile_n, 1), in_map),
            ],
            out_specs=[
                pl.BlockSpec((1, 1, 1), lambda core, step: (core, 0, 0)),
                pl.BlockSpec((1, 1, 1), lambda core, step: (core, 0, 0)),
            ],
            scratch_shapes=[pltpu.VMEM((1, 1), jnp.float32),
                            pltpu.VMEM((1, 1), jnp.float32)]),
        compiler_params=pltpu.CompilerParams(
            dimension_semantics=("parallel", "arbitrary"),
            vmem_limit_bytes=_xe_vmem_limit_bytes(tile_n, c, itemsize, vmem_cap)),
        cost_estimate=cost,
    )(logits, targets2d)

    total = jnp.sum(loss_parts)
    count = jnp.sum(cnt_parts)
    return jnp.where(count > 0, total / count, jnp.float32(0.0))


# ---------------------------------------------------------------------------
# Kernel 2: ONE fused pallas_call for all the small single-shot losses:
#   BatchTriplet, Image-Text Matching (C=2 XE), masked MSE, masked KL.
# ---------------------------------------------------------------------------
def _triplet_body(img_ref, txt_t_ref, out_ref, margin, max_violation):
    # TODO(synk): xmodaler's BatchTriplet is external; standard VSE++ hinge on
    # raw dot-product similarities is implemented (no internal L2 normalize).
    v = img_ref[...]                                   # (B, D) native dtype
    t_t = txt_t_ref[...]                               # (D, B) pre-transposed RHS
    scores = jax.lax.dot_general(                      # (B, B), MXU, f32 accumulate
        v, t_t, (((1,), (0,)), ((), ())),
        preferred_element_type=jnp.float32)
    b = scores.shape[0]
    rows = jax.lax.broadcasted_iota(jnp.int32, (b, b), 0)
    cols = jax.lax.broadcasted_iota(jnp.int32, (b, b), 1)
    eye = rows == cols
    diag = jnp.where(eye, scores, 0.0)
    d_col = jnp.sum(diag, axis=1, keepdims=True)       # (B, 1): s(i, i)
    d_row = jnp.sum(diag, axis=0, keepdims=True)       # (1, B): s(j, j)
    margin_f = jnp.float32(margin)
    cost_s = jnp.where(eye, 0.0, jnp.maximum(margin_f + scores - d_col, 0.0))
    cost_im = jnp.where(eye, 0.0, jnp.maximum(margin_f + scores - d_row, 0.0))
    if max_violation:
        s_term = jnp.sum(jnp.max(cost_s, axis=1, keepdims=True),
                         axis=(0, 1), keepdims=True)
        im_term = jnp.sum(jnp.max(cost_im, axis=0, keepdims=True),
                          axis=(0, 1), keepdims=True)
    else:
        s_term = jnp.sum(cost_s, axis=(0, 1), keepdims=True)
        im_term = jnp.sum(cost_im, axis=(0, 1), keepdims=True)
    out_ref[...] = s_term + im_term


def _itm_xe_body(logits_ref, lab_ref, out_ref):
    logits = logits_ref[...].astype(jnp.float32)       # (N, 2)
    tgt = lab_ref[...]                                 # (N, 1) i32
    n, c = logits.shape
    valid = tgt >= 0
    m = jnp.max(logits, axis=-1, keepdims=True)
    lse = m + jnp.log(jnp.sum(jnp.exp(logits - m), axis=-1, keepdims=True))
    cols = jax.lax.broadcasted_iota(jnp.int32, (n, c), 1)
    picked = jnp.sum(jnp.where(cols == tgt, logits, 0.0), axis=-1, keepdims=True)
    row_loss = jnp.where(valid, lse - picked, 0.0)
    cnt = jnp.sum(valid.astype(jnp.float32), axis=(0, 1), keepdims=True)
    tot = jnp.sum(row_loss, axis=(0, 1), keepdims=True)
    out_ref[...] = jnp.where(cnt > 0, tot / cnt, 0.0)


def _masked_mse_body(reg_ref, tgt, mask, n_sel, out_ref):
    reg = reg_ref[...].astype(jnp.float32)             # (Nv, C)
    c = reg.shape[1]
    diff = (reg - tgt) * mask
    sq = jnp.sum(diff * diff, axis=(0, 1), keepdims=True)
    denom = n_sel * jnp.float32(c)
    out_ref[...] = jnp.where(denom > 0, sq / denom, 0.0)


def _masked_kl_body(log_ref, tgt, mask, n_sel, out_ref):
    logits = log_ref[...].astype(jnp.float32)          # (Nv, C)
    m = jnp.max(logits, axis=-1, keepdims=True)
    lse = jnp.log(jnp.sum(jnp.exp(logits - m), axis=-1, keepdims=True))
    logp = (logits - m) - lse
    safe_logt = jnp.log(jnp.where(tgt > 0, tgt, 1.0))
    kl = jnp.where(tgt > 0, tgt * (safe_logt - logp), 0.0) * mask
    tot = jnp.sum(kl, axis=(0, 1), keepdims=True)
    out_ref[...] = jnp.where(n_sel > 0, tot / n_sel, 0.0)


def _make_small_losses_kernel(has_triplet, has_itm, has_vreg, has_vlog,
                              margin, max_violation):
    n_in = 2 * int(has_triplet) + 2 * int(has_itm)
    if has_vreg or has_vlog:
        n_in += int(has_vreg) + int(has_vlog) + 2

    def kernel(*refs):
        ins = refs[:n_in]
        outs = refs[n_in:]
        ii = 0
        oo = 0
        if has_triplet:
            _triplet_body(ins[ii], ins[ii + 1], outs[oo], margin, max_violation)
            ii += 2
            oo += 1
        if has_itm:
            _itm_xe_body(ins[ii], ins[ii + 1], outs[oo])
            ii += 2
            oo += 1
        if has_vreg or has_vlog:
            reg_ref = None
            log_ref = None
            if has_vreg:
                reg_ref = ins[ii]
                ii += 1
            if has_vlog:
                log_ref = ins[ii]
                ii += 1
            tgt_ref, lab_ref = ins[ii], ins[ii + 1]
            ii += 2
            tgt = tgt_ref[...].astype(jnp.float32)            # shared load
            mask = (lab_ref[...] > 0).astype(jnp.float32)     # (Nv, 1)
            n_sel = jnp.sum(mask, axis=(0, 1), keepdims=True)
            if has_vreg:
                _masked_mse_body(reg_ref, tgt, mask, n_sel, outs[oo])
                oo += 1
            if has_vlog:
                _masked_kl_body(log_ref, tgt, mask, n_sel, outs[oo])
                oo += 1

    return kernel


def fused_small_losses(*, triplet=None, itm=None, visual=None,
                       margin=0.2, max_violation=True):
    """One pallas_call covering whichever of the small losses are present.

    triplet: (img_feat (B,D), txt_feat (B,D)) or None
    itm:     (itm_logits (N,2), itm_labels (N,)) or None
    visual:  dict(reg=(Nv,C) or None, logits=(Nv,C) or None,
                  target=(Nv,C), labels=(Nv,)) or None
    Returns dict with keys among {"triplet", "itm", "mse", "kl"}.
    """
    has_triplet = triplet is not None
    has_itm = itm is not None
    has_vreg = visual is not None and visual.get("reg") is not None
    has_vlog = visual is not None and visual.get("logits") is not None

    args = []
    out_shapes = []
    names = []
    if has_triplet:
        img, txt = triplet
        args += [img, jnp.transpose(txt)]           # layout-friendly MXU RHS
        out_shapes.append(_scalar_out())
        names.append("triplet")
    if has_itm:
        lg, lb = itm
        args += [lg, lb.astype(jnp.int32).reshape(-1, 1)]
        out_shapes.append(_scalar_out())
        names.append("itm")
    if has_vreg or has_vlog:
        if has_vreg:
            args.append(visual["reg"])
            out_shapes.append(_scalar_out())
            names.append("mse")
        if has_vlog:
            args.append(visual["logits"])
            out_shapes.append(_scalar_out())
            names.append("kl")
        args += [visual["target"],
                 visual["labels"].astype(jnp.int32).reshape(-1, 1)]

    if not args:
        return {}

    # TODO(synk): row-tile this fused kernel (like masked_cross_entropy) if the
    # visual N*C ever approaches VMEM size; typical object counts fit easily.
    kernel = _make_small_losses_kernel(has_triplet, has_itm, has_vreg, has_vlog,
                                       float(margin), bool(max_violation))
    outs = pl.pallas_call(
        kernel,
        out_shape=tuple(out_shapes),
        in_specs=[_VMEM] * len(args),
        out_specs=tuple(_VMEM for _ in out_shapes),
    )(*args)
    if not isinstance(outs, (tuple, list)):
        outs = (outs,)
    return {name: o[0, 0] for name, o in zip(names, outs)}


# ---------------------------------------------------------------------------
# PretrainLosses.forward equivalent
# ---------------------------------------------------------------------------
def _flatten_visual(x, v_targets):
    if v_targets.shape[1] + 1 == x.shape[1]:
        x = x[:, 1:, :]
    return x.reshape(-1, x.shape[-1])


def pretrain_losses(batched_inputs, margin=0.2, max_violation=True):
    ret = {}

    # ---- collect the small single-shot losses into ONE fused pallas_call ----
    triplet_args = None
    itm_args = None
    visual_args = None

    if "OUTPUT" in batched_inputs:
        triplet_args = batched_inputs["OUTPUT"]

    if "ITM_LOGITS" in batched_inputs:
        itm_args = (batched_inputs["ITM_LOGITS"].reshape(-1, 2),
                    batched_inputs["ITM_NEG_LABEL"].reshape(-1))

    has_vreg = "V_REGRESS" in batched_inputs
    has_vlog = "V_LOGITS" in batched_inputs
    if has_vreg or has_vlog:
        v_targets = batched_inputs["V_TARGET"]
        visual_args = {
            "target": v_targets.reshape(-1, v_targets.shape[-1]),
            "labels": batched_inputs["V_TARGET_LABELS"].reshape(-1),
            "reg": (_flatten_visual(batched_inputs["V_REGRESS"], v_targets)
                    if has_vreg else None),
            "logits": (_flatten_visual(batched_inputs["V_LOGITS"], v_targets)
                       if has_vlog else None),
        }

    small = fused_small_losses(triplet=triplet_args, itm=itm_args,
                               visual=visual_args, margin=margin,
                               max_violation=max_violation)
    # TODO(synk): when zero rows are selected the masked losses report 0.0
    # instead of the key being omitted (keeps static shapes / no host sync).
    if "triplet" in small:
        ret["BatchTriplet Loss"] = small["triplet"] / jnp.float32(
            len(batched_inputs["IDS"]))
    if "itm" in small:
        ret["Image Text Matching"] = small["itm"]
    if "mse" in small:
        ret["Masked Object Feature Regression"] = small["mse"]
    if "kl" in small:
        ret["Masked Object Classification"] = small["kl"]

    # ---- Masked Language Modeling (streaming tiled XE kernel) ----------------
    if "U_LOGITS" in batched_inputs:
        u_logits = batched_inputs["U_LOGITS"]
        u_logits = u_logits.reshape(-1, u_logits.shape[-1])
        u_targets = batched_inputs["U_TARGET_IDS"].reshape(-1)
        ret["Masked Language Modeling"] = masked_cross_entropy(u_logits, u_targets)

    # ---- Masked Sentence Generation ------------------------------------------
    if "G_LOGITS" in batched_inputs:
        g_logits = batched_inputs["G_LOGITS"]
        g_logits = g_logits.reshape(-1, g_logits.shape[-1])
        g_targets = batched_inputs["G_TARGET_IDS"].reshape(-1)
        ret["Masked Sentence Generation"] = masked_cross_entropy(g_logits, g_targets)

    if len(ret) == 0:
        ret["No Loss in this Iteration"] = jnp.float32(0.0)
    return ret


# ---------------------------------------------------------------------------
# Demo / smoke test
# ---------------------------------------------------------------------------
def _xe_reference(logits, targets):
    lp = jax.nn.log_softmax(logits.astype(jnp.float32), axis=-1)
    valid = targets >= 0
    t = jnp.where(valid, targets, 0)
    nll = -jnp.take_along_axis(lp, t[:, None], axis=-1)[:, 0]
    nll = jnp.where(valid, nll, 0.0)
    cnt = jnp.sum(valid.astype(jnp.float32))
    return jnp.where(cnt > 0, jnp.sum(nll) / cnt, 0.0)


if __name__ == "__main__":
    key = jax.random.PRNGKey(0)
    ks = jax.random.split(key, 16)

    B = 2          # batch (len(IDS))
    D = 32         # feature dim (also #object classes so V_TARGET is dual-use)
    Sv = 4         # visual tokens (V_REGRESS/V_LOGITS carry an extra CLS token)
    St = 8         # text sequence length
    V = 128        # vocab size

    img_feat = jax.random.normal(ks[0], (B, D), jnp.float32)
    txt_feat = jax.random.normal(ks[1], (B, D), jnp.float32)

    itm_logits = jax.random.normal(ks[2], (B, 2), jnp.float32)
    itm_labels = jnp.array([0, 1], jnp.int32)

    v_regress = jax.random.normal(ks[3], (B, Sv + 1, D), jnp.float32)
    v_logits = jax.random.normal(ks[4], (B, Sv + 1, D), jnp.float32)
    v_target = jax.nn.softmax(jax.random.normal(ks[5], (B, Sv, D), jnp.float32), axis=-1)
    v_target_labels = jnp.array([[1, 0, 2, 0], [0, 3, 1, 0]], jnp.int32)

    u_logits = jax.random.normal(ks[6], (B, St, V), jnp.float32)
    u_target_ids = jnp.where(
        jax.random.uniform(ks[7], (B, St)) < 0.5,
        jax.random.randint(ks[8], (B, St), 0, V), -1).astype(jnp.int32)

    g_logits = jax.random.normal(ks[9], (B, St, V), jnp.float32)
    g_target_ids = jnp.where(
        jax.random.uniform(ks[10], (B, St)) < 0.5,
        jax.random.randint(ks[11], (B, St), 0, V), -1).astype(jnp.int32)

    batched_inputs = {
        "IDS": list(range(B)),
        "OUTPUT": (img_feat, txt_feat),
        "ITM_LOGITS": itm_logits,
        "ITM_NEG_LABEL": itm_labels,
        "V_REGRESS": v_regress,
        "V_LOGITS": v_logits,
        "V_TARGET": v_target,
        "V_TARGET_LABELS": v_target_labels,
        "U_LOGITS": u_logits,
        "U_TARGET_IDS": u_target_ids,
        "G_LOGITS": g_logits,
        "G_TARGET_IDS": g_target_ids,
    }

    losses = pretrain_losses(batched_inputs, margin=0.2, max_violation=True)
    for v in losses.values():
        jax.block_until_ready(v)

    # Also exercise the multi-block / per-core partial-output path of the tiled
    # XE kernel (small forced tile) and check against a pure-JAX reference.
    n_chk, v_chk = 40, 128
    chk_logits = jax.random.normal(ks[12], (n_chk, v_chk), jnp.float32)
    chk_tgt = jnp.where(
        jax.random.uniform(ks[13], (n_chk,)) < 0.7,
        jax.random.randint(ks[14], (n_chk,), 0, v_chk), -1).astype(jnp.int32)
    got = masked_cross_entropy(chk_logits, chk_tgt, row_tile=8)
    want = _xe_reference(chk_logits, chk_tgt)
    jax.block_until_ready(got)
    assert jnp.allclose(got, want, rtol=1e-4, atol=1e-4), (float(got), float(want))

    print("KERNEL_OK")
</pallas_src>

<mosaic_0001>
module attributes {stable_mosaic.version = 11 : i64} {
  func.func @kernel(%arg0: memref<2x32xf32, #tpu.memory_space<vmem>>, %arg1: memref<32x2xf32, #tpu.memory_space<vmem>>, %arg2: memref<2x2xf32, #tpu.memory_space<vmem>>, %arg3: memref<2x1xi32, #tpu.memory_space<vmem>>, %arg4: memref<8x32xf32, #tpu.memory_space<vmem>>, %arg5: memref<8x32xf32, #tpu.memory_space<vmem>>, %arg6: memref<8x32xf32, #tpu.memory_space<vmem>>, %arg7: memref<8x1xi32, #tpu.memory_space<vmem>>, %arg8: memref<1x1xf32, #tpu.memory_space<vmem>>, %arg9: memref<1x1xf32, #tpu.memory_space<vmem>>, %arg10: memref<1x1xf32, #tpu.memory_space<vmem>>, %arg11: memref<1x1xf32, #tpu.memory_space<vmem>>) attributes {dimension_semantics = [], scalar_prefetch = 0 : i64, scratch_operands = 0 : i64, tpu.core_type = #tpu.core_type<tc>} {
    %c0 = arith.constant 0 : index
    %c0_0 = arith.constant 0 : index
    %0 = vector.load %arg0[%c0, %c0_0] : memref<2x32xf32, #tpu.memory_space<vmem>>, vector<2x32xf32>
    %c0_1 = arith.constant 0 : index
    %c0_2 = arith.constant 0 : index
    %1 = vector.load %arg1[%c0_1, %c0_2] : memref<32x2xf32, #tpu.memory_space<vmem>>, vector<32x2xf32>
    %cst = arith.constant dense<0.000000e+00> : vector<2x2xf32>
    %2 = tpu.matmul %0, %1, %cst {dimension_numbers = #tpu.dot_dimension_numbers<[1], [0], [0], [1], [0, 0, 1, 1], [], []>} : vector<2x32xf32>, vector<32x2xf32>, vector<2x2xf32> -> vector<2x2xf32>
    %3 = tpu.iota {dimensions = array<i32: 0>} : vector<2x2xi32>
    %4 = tpu.iota {dimensions = array<i32: 1>} : vector<2x2xi32>
    %5 = arith.cmpi eq, %3, %4 : vector<2x2xi32>
    %cst_3 = arith.constant 0.000000e+00 : f32
    %6 = vector.broadcast %cst_3 : f32 to vector<2x2xf32>
    %7 = arith.select %5, %2, %6 : vector<2x2xi1>, vector<2x2xf32>
    %cst_4 = arith.constant dense<0.000000e+00> : vector<2xf32>
    %8 = vector.multi_reduction <add>, %7, %cst_4 [1] : vector<2x2xf32> to vector<2xf32>
    %9 = vector.shape_cast %8 : vector<2xf32> to vector<2x1xf32>
    %cst_5 = arith.constant dense<0.000000e+00> : vector<2xf32>
    %10 = vector.multi_reduction <add>, %7, %cst_5 [0] : vector<2x2xf32> to vector<2xf32>
    %11 = vector.shape_cast %10 : vector<2xf32> to vector<1x2xf32>
    %cst_6 = arith.constant 2.000000e-01 : f32
    %12 = vector.broadcast %cst_6 : f32 to vector<2x2xf32>
    %13 = arith.addf %12, %2 : vector<2x2xf32>
    %14 = vector.broadcast %9 : vector<2x1xf32> to vector<2x2xf32>
    %15 = arith.subf %13, %14 : vector<2x2xf32>
    %cst_7 = arith.constant 0.000000e+00 : f32
    %16 = vector.broadcast %cst_7 : f32 to vector<2x2xf32>
    %17 = arith.maximumf %15, %16 : vector<2x2xf32>
    %cst_8 = arith.constant 0.000000e+00 : f32
    %18 = vector.broadcast %cst_8 : f32 to vector<2x2xf32>
    %19 = arith.select %5, %18, %17 : vector<2x2xi1>, vector<2x2xf32>
    %cst_9 = arith.constant 2.000000e-01 : f32
    %20 = vector.broadcast %cst_9 : f32 to vector<2x2xf32>
    %21 = arith.addf %20, %2 : vector<2x2xf32>
    %22 = vector.broadcast %11 : vector<1x2xf32> to vector<2x2xf32>
    %23 = arith.subf %21, %22 : vector<2x2xf32>
    %cst_10 = arith.constant 0.000000e+00 : f32
    %24 = vector.broadcast %cst_10 : f32 to vector<2x2xf32>
    %25 = arith.maximumf %23, %24 : vector<2x2xf32>
    %cst_11 = arith.constant 0.000000e+00 : f32
    %26 = vector.broadcast %cst_11 : f32 to vector<2x2xf32>
    %27 = arith.select %5, %26, %25 : vector<2x2xi1>, vector<2x2xf32>
    %cst_12 = arith.constant dense<0xFF800000> : vector<2xf32>
    %28 = vector.multi_reduction <maximumf>, %19, %cst_12 [1] : vector<2x2xf32> to vector<2xf32>
    %29 = vector.shape_cast %28 : vector<2xf32> to vector<2x1xf32>
    %30 = vector.shape_cast %29 : vector<2x1xf32> to vector<1x2x1xf32>
    %cst_13 = arith.constant dense<0.000000e+00> : vector<1xf32>
    %31 = vector.multi_reduction <add>, %30, %cst_13 [1, 2] : vector<1x2x1xf32> to vector<1xf32>
    %32 = vector.shape_cast %31 : vector<1xf32> to vector<1x1x1xf32>
    %33 = vector.extract %32[0, 0, 0] : f32 from vector<1x1x1xf32>
    %34 = vector.broadcast %33 : f32 to vector<1x1xf32>
    %cst_14 = arith.constant dense<0xFF800000> : vector<2xf32>
    %35 = vector.multi_reduction <maximumf>, %27, %cst_14 [0] : vector<2x2xf32> to vector<2xf32>
    %36 = vector.shape_cast %35 : vector<2xf32> to vector<1x2xf32>
    %37 = vector.shape_cast %36 : vector<1x2xf32> to vector<1x1x2xf32>
    %cst_15 = arith.constant dense<0.000000e+00> : vector<1xf32>
    %38 = vector.multi_reduction <add>, %37, %cst_15 [1, 2] : vector<1x1x2xf32> to vector<1xf32>
    %39 = vector.shape_cast %38 : vector<1xf32> to vector<1x1x1xf32>
    %40 = vector.extract %39[0, 0, 0] : f32 from vector<1x1x1xf32>
    %41 = vector.broadcast %40 : f32 to vector<1x1xf32>
    %42 = arith.addf %34, %41 : vector<1x1xf32>
    %c0_16 = arith.constant 0 : index
    %c0_17 = arith.constant 0 : index
    %43 = vector.load %arg8[%c0_16, %c0_17] : memref<1x1xf32, #tpu.memory_space<vmem>>, vector<1x1xf32>
    tpu.vector_store %arg8[%c0_16, %c0_17], %42 {strides = array<i32>} : memref<1x1xf32, #tpu.memory_space<vmem>>, vector<1x1xf32>,
    %c0_18 = arith.constant 0 : index
    %c0_19 = arith.constant 0 : index
    %44 = vector.load %arg2[%c0_18, %c0_19] : memref<2x2xf32, #tpu.memory_space<vmem>>, vector<2x2xf32>
    %c0_20 = arith.constant 0 : index
    %c0_21 = arith.constant 0 : index
    %45 = vector.load %arg3[%c0_20, %c0_21] : memref<2x1xi32, #tpu.memory_space<vmem>>, vector<2x1xi32>
    %c0_i32 = arith.constant 0 : i32
    %46 = vector.broadcast %c0_i32 : i32 to vector<2x1xi32>
    %47 = arith.cmpi sge, %45, %46 : vector<2x1xi32>
    %cst_22 = arith.constant dense<0xFF800000> : vector<2xf32>
    %48 = vector.multi_reduction <maximumf>, %44, %cst_22 [1] : vector<2x2xf32> to vector<2xf32>
    %49 = vector.shape_cast %48 : vector<2xf32> to vector<2x1xf32>
    %50 = vector.broadcast %49 : vector<2x1xf32> to vector<2x2xf32>
    %51 = arith.subf %44, %50 : vector<2x2xf32>
    %52 = math.exp %51 : vector<2x2xf32>
    %cst_23 = arith.constant dense<0.000000e+00> : vector<2xf32>
    %53 = vector.multi_reduction <add>, %52, %cst_23 [1] : vector<2x2xf32> to vector<2xf32>
    %54 = vector.shape_cast %53 : vector<2xf32> to vector<2x1xf32>
    %55 = math.log %54 : vector<2x1xf32>
    %56 = arith.addf %49, %55 : vector<2x1xf32>
    %57 = tpu.iota {dimensions = array<i32: 1>} : vector<2x2xi32>
    %58 = vector.broadcast %45 : vector<2x1xi32> to vector<2x2xi32>
    %59 = arith.cmpi eq, %57, %58 : vector<2x2xi32>
    %cst_24 = arith.constant 0.000000e+00 : f32
    %60 = vector.broadcast %cst_24 : f32 to vector<2x2xf32>
    %61 = arith.select %59, %44, %60 : vector<2x2xi1>, vector<2x2xf32>
    %cst_25 = arith.constant dense<0.000000e+00> : vector<2xf32>
    %62 = vector.multi_reduction <add>, %61, %cst_25 [1] : vector<2x2xf32> to vector<2xf32>
    %63 = vector.shape_cast %62 : vector<2xf32> to vector<2x1xf32>
    %64 = arith.subf %56, %63 : vector<2x1xf32>
    %cst_26 = arith.constant 0.000000e+00 : f32
    %65 = vector.broadcast %cst_26 : f32 to vector<2x1xf32>
    %66 = arith.select %47, %64, %65 : vector<2x1xi1>, vector<2x1xf32>
    %67 = arith.extui %47 : vector<2x1xi1> to vector<2x1xi32>
    %68 = arith.sitofp %67 : vector<2x1xi32> to vector<2x1xf32>
    %69 = vector.shape_cast %68 : vector<2x1xf32> to vector<1x2x1xf32>
    %cst_27 = arith.constant dense<0.000000e+00> : vector<1xf32>
    %70 = vector.multi_reduction <add>, %69, %cst_27 [1, 2] : vector<1x2x1xf32> to vector<1xf32>
    %71 = vector.shape_cast %70 : vector<1xf32> to vector<1x1x1xf32>
    %72 = vector.extract %71[0, 0, 0] : f32 from vector<1x1x1xf32>
    %73 = vector.broadcast %72 : f32 to vector<1x1xf32>
    %74 = vector.shape_cast %66 : vector<2x1xf32> to vector<1x2x1xf32>
    %cst_28 = arith.constant dense<0.000000e+00> : vector<1xf32>
    %75 = vector.multi_reduction <add>, %74, %cst_28 [1, 2] : vector<1x2x1xf32> to vector<1xf32>
    %76 = vector.shape_cast %75 : vector<1xf32> to vector<1x1x1xf32>
    %77 = vector.extract %76[0, 0, 0] : f32 from vector<1x1x1xf32>
    %78 = vector.broadcast %77 : f32 to vector<1x1xf32>
    %cst_29 = arith.constant 0.000000e+00 : f32
    %79 = vector.broadcast %cst_29 : f32 to vector<1x1xf32>
    %80 = arith.cmpf ogt, %73, %79 : vector<1x1xf32>
    %81 = arith.divf %78, %73 : vector<1x1xf32>
    %cst_30 = arith.constant 0.000000e+00 : f32
    %82 = vector.broadcast %cst_30 : f32 to vector<1x1xf32>
    %83 = arith.select %80, %81, %82 : vector<1x1xi1>, vector<1x1xf32>
    %c0_31 = arith.constant 0 : index
    %c0_32 = arith.constant 0 : index
    %84 = vector.load %arg9[%c0_31, %c0_32] : memref<1x1xf32, #tpu.memory_space<vmem>>, vector<1x1xf32>
    tpu.vector_store %arg9[%c0_31, %c0_32], %83 {strides = array<i32>} : memref<1x1xf32, #tpu.memory_space<vmem>>, vector<1x1xf32>,
    %c0_33 = arith.constant 0 : index
    %c0_34 = arith.constant 0 : index
    %85 = vector.load %arg6[%c0_33, %c0_34] : memref<8x32xf32, #tpu.memory_space<vmem>>, vector<8x32xf32>
    %c0_35 = arith.constant 0 : index
    %c0_36 = arith.constant 0 : index
    %86 = vector.load %arg7[%c0_35, %c0_36] : memref<8x1xi32, #tpu.memory_space<vmem>>, vector<8x1xi32>
    %c0_i32_37 = arith.constant 0 : i32
    %87 = vector.broadcast %c0_i32_37 : i32 to vector<8x1xi32>
    %88 = arith.cmpi sgt, %86, %87 : vector<8x1xi32>
    %89 = arith.extui %88 : vector<8x1xi1> to vector<8x1xi32>
    %90 = arith.sitofp %89 : vector<8x1xi32> to vector<8x1xf32>
    %91 = vector.shape_cast %90 : vector<8x1xf32> to vector<1x8x1xf32>
    %cst_38 = arith.constant dense<0.000000e+00> : vector<1xf32>
    %92 = vector.multi_reduction <add>, %91, %cst_38 [1, 2] : vector<1x8x1xf32> to vector<1xf32>
    %93 = vector.shape_cast %92 : vector<1xf32> to vector<1x1x1xf32>
    %94 = vector.extract %93[0, 0, 0] : f32 from vector<1x1x1xf32>
    %95 = vector.broadcast %94 : f32 to vector<1x1xf32>
    %c0_39 = arith.constant 0 : index
    %c0_40 = arith.constant 0 : index
    %96 = vector.load %arg4[%c0_39, %c0_40] : memref<8x32xf32, #tpu.memory_space<vmem>>, vector<8x32xf32>
    %97 = arith.subf %96, %85 : vector<8x32xf32>
    %98 = vector.broadcast %90 : vector<8x1xf32> to vector<8x32xf32>
    %99 = arith.mulf %97, %98 : vector<8x32xf32>
    %100 = arith.mulf %99, %99 : vector<8x32xf32>
    %101 = vector.shape_cast %100 : vector<8x32xf32> to vector<1x8x32xf32>
    %cst_41 = arith.constant dense<0.000000e+00> : vector<1xf32>
    %102 = vector.multi_reduction <add>, %101, %cst_41 [1, 2] : vector<1x8x32xf32> to vector<1xf32>
    %103 = vector.shape_cast %102 : vector<1xf32> to vector<1x1x1xf32>
    %104 = vector.extract %103[0, 0, 0] : f32 from vector<1x1x1xf32>
    %105 = vector.broadcast %104 : f32 to vector<1x1xf32>
    %cst_42 = arith.constant 3.200000e+01 : f32
    %106 = vector.broadcast %cst_42 : f32 to vector<1x1xf32>
    %107 = arith.mulf %95, %106 : vector<1x1xf32>
    %cst_43 = arith.constant 0.000000e+00 : f32
    %108 = vector.broadcast %cst_43 : f32 to vector<1x1xf32>
    %109 = arith.cmpf ogt, %107, %108 : vector<1x1xf32>
    %110 = arith.divf %105, %107 : vector<1x1xf32>
    %cst_44 = arith.constant 0.000000e+00 : f32
    %111 = vector.broadcast %cst_44 : f32 to vector<1x1xf32>
    %112 = arith.select %109, %110, %111 : vector<1x1xi1>, vector<1x1xf32>
    %c0_45 = arith.constant 0 : index
    %c0_46 = arith.constant 0 : index
    %113 = vector.load %arg10[%c0_45, %c0_46] : memref<1x1xf32, #tpu.memory_space<vmem>>, vector<1x1xf32>
    tpu.vector_store %arg10[%c0_45, %c0_46], %112 {strides = array<i32>} : memref<1x1xf32, #tpu.memory_space<vmem>>, vector<1x1xf32>,
    %c0_47 = arith.constant 0 : index
    %c0_48 = arith.constant 0 : index
    %114 = vector.load %arg5[%c0_47, %c0_48] : memref<8x32xf32, #tpu.memory_space<vmem>>, vector<8x32xf32>
    %cst_49 = arith.constant dense<0xFF800000> : vector<8xf32>
    %115 = vector.multi_reduction <maximumf>, %114, %cst_49 [1] : vector<8x32xf32> to vector<8xf32>
    %116 = vector.shape_cast %115 : vector<8xf32> to vector<8x1xf32>
    %117 = vector.broadcast %116 : vector<8x1xf32> to vector<8x32xf32>
    %118 = arith.subf %114, %117 : vector<8x32xf32>
    %119 = math.exp %118 : vector<8x32xf32>
    %cst_50 = arith.constant dense<0.000000e+00> : vector<8xf32>
    %120 = vector.multi_reduction <add>, %119, %cst_50 [1] : vector<8x32xf32> to vector<8xf32>
    %121 = vector.shape_cast %120 : vector<8xf32> to vector<8x1xf32>
    %122 = math.log %121 : vector<8x1xf32>
    %123 = vector.broadcast %116 : vector<8x1xf32> to vector<8x32xf32>
    %124 = arith.subf %114, %123 : vector<8x32xf32>
    %125 = vector.broadcast %122 : vector<8x1xf32> to vector<8x32xf32>
    %126 = arith.subf %124, %125 : vector<8x32xf32>
    %cst_51 = arith.constant 0.000000e+00 : f32
    %127 = vector.broadcast %cst_51 : f32 to vector<8x32xf32>
    %128 = arith.cmpf ogt, %85, %127 : vector<8x32xf32>
    %cst_52 = arith.constant 1.000000e+00 : f32
    %129 = vector.broadcast %cst_52 : f32 to vector<8x32xf32>
    %130 = arith.select %128, %85, %129 : vector<8x32xi1>, vector<8x32xf32>
    %131 = math.log %130 : vector<8x32xf32>
    %cst_53 = arith.constant 0.000000e+00 : f32
    %132 = vector.broadcast %cst_53 : f32 to vector<8x32xf32>
    %133 = arith.cmpf ogt, %85, %132 : vector<8x32xf32>
    %134 = arith.subf %131, %126 : vector<8x32xf32>
    %135 = arith.mulf %85, %134 : vector<8x32xf32>
    %cst_54 = arith.constant 0.000000e+00 : f32
    %136 = vector.broadcast %cst_54 : f32 to vector<8x32xf32>
    %137 = arith.select %133, %135, %136 : vector<8x32xi1>, vector<8x32xf32>
    %138 = vector.broadcast %90 : vector<8x1xf32> to vector<8x32xf32>
    %139 = arith.mulf %137, %138 : vector<8x32xf32>
    %140 = vector.shape_cast %139 : vector<8x32xf32> to vector<1x8x32xf32>
    %cst_55 = arith.constant dense<0.000000e+00> : vector<1xf32>
    %141 = vector.multi_reduction <add>, %140, %cst_55 [1, 2] : vector<1x8x32xf32> to vector<1xf32>
    %142 = vector.shape_cast %141 : vector<1xf32> to vector<1x1x1xf32>
    %143 = vector.extract %142[0, 0, 0] : f32 from vector<1x1x1xf32>
    %144 = vector.broadcast %143 : f32 to vector<1x1xf32>
    %cst_56 = arith.constant 0.000000e+00 : f32
    %145 = vector.broadcast %cst_56 : f32 to vector<1x1xf32>
    %146 = arith.cmpf ogt, %95, %145 : vector<1x1xf32>
    %147 = arith.divf %144, %95 : vector<1x1xf32>
    %cst_57 = arith.constant 0.000000e+00 : f32
    %148 = vector.broadcast %cst_57 : f32 to vector<1x1xf32>
    %149 = arith.select %146, %147, %148 : vector<1x1xi1>, vector<1x1xf32>
    %c0_58 = arith.constant 0 : index
    %c0_59 = arith.constant 0 : index
    %150 = vector.load %arg11[%c0_58, %c0_59] : memref<1x1xf32, #tpu.memory_space<vmem>>, vector<1x1xf32>
    tpu.vector_store %arg11[%c0_58, %c0_59], %149 {strides = array<i32>} : memref<1x1xf32, #tpu.memory_space<vmem>>, vector<1x1xf32>,
    return
  }
}

</mosaic_0001>

<bundles_post_ra>
// kernel: tpu_custom_call.1
= control target key start
LH: loop header
LB: loop body
LE: loop exit
PB: predicated region body
PF: predicated region fallthrough
CT: control target
= control target key end

     0   :  { %17 = vsyncpa [#allocation3], 0  ;;  %s733_s0 = inlined_call_operand.vmem [shape: f32[2,32], index: 0, kind: input, shape index: {}]   ;;  %s734_s1 = inlined_call_operand.vmem [shape: f32[32,2], index: 1, kind: input, shape index: {}]   ;;  %s735_s2 = inlined_call_operand.vmem [shape: f32[2,2], index: 2, kind: input, shape index: {}]   ;;  %s736_s3 = inlined_call_operand.vmem [shape: s32[2,1], index: 3, kind: input, shape index: {}]   ;;  %s737_s4 = inlined_call_operand.vmem [shape: f32[8,32], index: 4, kind: input, shape index: {}]   ;;  %s738_s5 = inlined_call_operand.vmem [shape: f32[8,32], index: 5, kind: input, shape index: {}]   ;;  %s739_s6 = inlined_call_operand.vmem [shape: f32[8,32], index: 6, kind: input, shape index: {}]   ;;  %s740_s7 = inlined_call_operand.vmem [shape: s32[8,1], index: 7, kind: input, shape index: {}]   ;;  %s741_s8 = inlined_call_operand.hbm [shape: f32[1,1], index: 8, kind: output, shape index: {0}]   ;;  %s742_s9 = inlined_call_operand.hbm [shape: f32[1,1], index: 9, kind: output, shape index: {1}]   ;;  %s743_s10 = inlined_call_operand.hbm [shape: f32[1,1], index: 10, kind: output, shape index: {2}]   ;;  %s744_s11 = inlined_call_operand.hbm [shape: f32[1,1], index: 11, kind: output, shape index: {3}]  }
   0x1   :  { %18 = vsyncpa [#allocation5], 0  ;;  %v37_v0 = vld [vmem:[%s734_s1] sm:$0xff]  ;;  %v38_v1 = vld [vmem:[%s734_s1 + $0x8] sm:$0xff]  ;;  %v523_v3 = vmov 0.0|0.0   ;;  %vm524_vm0 = vmmov 0  }
   0x2   :  { %v39_v2 = vld [vmem:[%s734_s1 + $0x10] sm:$0xff]  ;;  %383 = vmatprep.subr.bf16.mxu0 %v523_v3  ;;  %v384_v4 = vpack.c.bf16 %v38_v1, %v37_v0  ;;  %v40_v5 = vld [vmem:[%s734_s1 + $0x18] sm:$0xff]  ;;  %v525_v6 = vmov 0.0   ;;  %vm121_vm1 = vcmask 9216   ;;  %v607_v7 = vld [vmem:[%s735_s2] sm:$0x3] }
   0x3   :  { %380 = vmatprep.mubr.msk.f32.mxu0 %vm524_vm0, %v525_v6  ;;  %v272_v8 = vld [vmem:[%s738_s5] sm:$0xff] }
   0x4   :  { %19 = vsyncpa [#allocation8], 0  ;;  %385 = vmatpush3.bf16.msra.mxu0 %v384_v4  ;;  %v387_v9 = vpack.c.bf16 %v40_v5, %v39_v2  ;;  %v178_v10 = vsel %vm121_vm1, %v607_v7, -inf  ;;  %vm41_vm2 = vcmask 261120   ;;  %v36_v12 = vld [vmem:[%s733_s0] sm:$0x3]  ;;  %v115_v24 = vlaneseq }
   0x5   :  { %386 = vmatprep.subr.bf16.mxu0 %v523_v3  ;;  %179 = vmax.xlane.f32.xlu0 %v178_v10  ;;  %v273_v11 = vsel %vm41_vm2, %v272_v8, -inf  ;;  %v526_v13 = vmov 0   ;;  %v230_v36 = vld [vmem:[%s740_s7] sm:$0xff]  ;;  %vm160_vm5 = vcmask 8192   ;;  %vm141_vm8 = vcmask 1024  }
   0x6   :  { %411 = vset.pattern.permute.xlu1 %v526_v13  ;;  %412 = vset.pattern.permute.xlu0 %v526_v13  ;;  %v116_v25 = vshrl.u32 %v115_v24, 7  ;;  %v118_v26 = vand.u32 127, %v115_v24  ;;  %v176_v38 = vld [vmem:[%s736_s3] sm:$0x3]  ;;  %vm231_vm4 = vcmp.gt.s32.totalorder %v230_v36, 0  ;;  %vm234_vm10 = vcmask 7168  }
   0x7   :  { %v366_v41 = vsel %vm231_vm4, 1.0, %v525_v6  ;;  %vm177_vm7 = vcmp.ge.s32.totalorder %v176_v38, 0  ;;  %v229_v63 = vld [vmem:[%s739_s6] sm:$0xff]  ;;  %s527_s6 = smov [#allocation2]   ;;  %vm173_vm11 = vcmask 0  }
   0x8   :  { %388 = vmatpush3.bf16.msra.mxu0 %v387_v9  ;;  %vm119_vm3 = vcmp.eq.s32.totalorder %v116_v25, %v118_v26  ;;  %v365_v59 = vsel %vm177_vm7, 1.0, %v525_v6  ;;  %vm285_vm9 = vcmp.gt.f32.partialorder %v229_v63, 0.0  ;;  %v246_v9 = vld [vmem:[%s737_s4] sm:$0xff]  ;;  %s315_s14 = sshll.u32 %s527_s6, 4  ;;  %s316_s14 = int_to_ptr.vmem [resolvable:$true] %s315_s14 }
   0x9   :  { %274 = vmax.xlane.f32.xlu0 %v273_v11  ;;  %v202_v61 = vsel %vm141_vm8, %v365_v59, 0.0  ;;  %v286_v1 = vsel %vm285_vm9, %v229_v63, 1.0  ;;  %s429_s19 = scalar_lea.vmem %s316_s14, 16  ;;  %s433_s20 = scalar_lea.vmem %s316_s14, 32 }
   0xa   :  { %p430_p0 = scmp.ne.s32.totalorder %s316_s14, %s429_s19  ;;  %p434_p1 = scmp.lt.s32.totalorder %s316_s14, %s316_s14 }
   0xb   :  { %381 = vmatmul.mubr.msk.f32.vlgmr.msra.gmra.mrb[0].mxu0 %vm41_vm2, %v36_v12  ;;  %p435_p2 = scmp.lt.s32.totalorder %s433_s20, %s429_s19 }
   0xd   :  { %p436_p3 = por %p435_p2, %p434_p1 }
   0xf   :  { %p437_p4 = pnand %p436_p3, %p430_p0 }
  0x92   :  { %v619_v14 = vpop.xlane.xlu0 %179 }
  0x93   :  { %v181_v15 = vsub.f32 %v607_v7, %v619_v14 }
  0x95   :  { %v182_v16 = vmul.f32 1.442695, %v181_v15  ;;  %v247_v15 = vsub.f32 %v246_v9, %v229_v63 }
  0x96   :  { %v275_v17 = vpop.xlane.xlu0 %274 }
  0x97   :  { %413 = vpow2.f32 %v182_v16  ;;  %v623_v18 = vsub.f32 %v272_v8, %v275_v17 }
  0x99   :  { %v277_v19 = vmul.f32 1.442695, %v623_v18 }
  0x9b   :  { %415 = vpow2.f32 %v277_v19 }
  0xa1   :  { %v414_v20 = vpop.eup %413 }
  0xa2   :  { %v184_v21 = vsel %vm121_vm1, %v414_v20, 0.0 }
  0xa3   :  { %185 = vadd.xlane.f32.xlu0 %v184_v21 }
  0xa5   :  { %v416_v22 = vpop.eup %415 }
  0xa6   :  { %v279_v23 = vsel %vm41_vm2, %v416_v22, 0.0  ;;  %v235_v22 = vsel %vm234_vm10, %v366_v41, 0.0 }
  0xa7   :  { %280 = vadd.xlane.f32.xlu0 %v279_v23 }
  0xde   :  { %v111_v27 = vpop.f32.mrb[0].mxu0 }
  0xdf   :  { %v120_v28 = vsel %vm119_vm3, %v111_v27, 0.0  ;;  %v382_v29 = vpop.f32.mrb[1].mxu0  ;;  %v131_v39 = vadd.f32 0.2, %v111_v27 }
  0xe0   :  { %v122_v30 = vsel %vm121_vm1, %v120_v28, 0.0 }
  0xe1   :  { %123 = vadd.xlane.f32.xlu1 %v122_v30  ;;  %v125_v31 = vrot.slane %v122_v30, 4 }
  0xe3   :  { %v126_v32 = vadd.f32 %v125_v31, %v122_v30 }
  0xe5   :  { %v127_v33 = vrot.slane %v126_v32, 2 }
  0xe7   :  { %v128_v34 = vadd.f32 %v127_v33, %v126_v32 }
  0xe9   :  { %v129_v35 = vrot.slane %v128_v34, 1 }
  0xeb   :  { %v130_v37 = vadd.f32 %v129_v35, %v128_v34 }
  0xed   :  { %v135_v40 = vsub.f32 %v131_v39, %v130_v37 }
  0xef   :  { %v136_v42 = vmax.f32 %v135_v40, 0.0 }
  0xf1   :  { %v137_v43 = vsel %vm119_vm3, 0.0, %v136_v42 }
  0xf2   :  { %191 = vperm.xlu1 %411, %v176_v38   ;;  %v153_v44 = vsel %vm121_vm1, %v137_v43, -inf }
  0xf3   :  { %v154_v45 = vrot.slane %v153_v44, 4 }
  0xf5   :  { %v155_v46 = vmax.f32 %v153_v44, %v154_v45 }
  0xf6   :  { %250 = vperm.xlu1 %411, %v366_v41  }
  0xf7   :  { %v156_v47 = vrot.slane %v155_v46, 2 }
  0xf9   :  { %v157_v48 = vmax.f32 %v155_v46, %v156_v47 }
  0xfb   :  { %v158_v49 = vrot.slane %v157_v48, 1 }
  0xfd   :  { %v159_v50 = vmax.f32 %v157_v48, %v158_v49 }
  0xff   :  { %v161_v51 = vsel %vm160_vm5, %v159_v50, 0.0 }
 0x11a   :  { %162 = vadd.xlane.f32.xlu1 %v161_v51 }
 0x130   :  { %v186_v62 = vpop.xlane.xlu0 %185 }
 0x131   :  { %417 = vlog2.f32 %v186_v62 }
 0x134   :  { %v281_v0 = vpop.xlane.xlu0 %280 }
 0x135   :  { %419 = vlog2.f32 %v281_v0 }
 0x136   :  { %421 = vlog2.f32 %v286_v1 }
 0x13b   :  { %v418_v2 = vpop.eup %417 }
 0x13c   :  { %v188_v3 = vmul.f32 0.6931472, %v418_v2 }
 0x13e   :  { %v189_v6 = vadd.f32 %v188_v3, %v619_v14 }
 0x13f   :  { %v420_v4 = vpop.eup %419 }
 0x140   :  { %v283_v5 = vmul.f32 0.6931472, %v420_v4 }
 0x142   :  { %v284_v11 = vsub.f32 %v623_v18, %v283_v5 }
 0x16e   :  { %v124_v52 = vpop.xlane.xlu1 %123 }
 0x16f   :  { %v132_v53 = vsub.f32 %v131_v39, %v124_v52 }
 0x171   :  { %v133_v54 = vmax.f32 %v132_v53, 0.0 }
 0x172   :  { %v192_v55 = vpop.permute.xlu1 %191 }
 0x173   :  { %vm193_vm6 = vcmp.eq.s32.totalorder %v118_v26, %v192_v55  ;;  %v134_v58 = vsel %vm119_vm3, 0.0, %v133_v54 }
 0x174   :  { %v194_v56 = vsel %vm193_vm6, %v607_v7, 0.0  ;;  %v138_v60 = vsel %vm121_vm1, %v134_v58, -inf  ;;  %v422_v7 = vpop.eup %421 }
 0x175   :  { %v195_v57 = vsel %vm121_vm1, %v194_v56, 0.0  ;;  %v288_v12 = vmul.f32 0.6931472, %v422_v7 }
 0x176   :  { %196 = vadd.xlane.f32.xlu0 %v195_v57  ;;  %v251_v17 = vpop.permute.xlu1 %250 }
 0x177   :  { %v289_v20 = vsub.f32 %v288_v12, %v284_v11  ;;  %v253_v14 = vmul.f32 %v251_v17, %v247_v15 }
 0x179   :  { %v290_v23 = vmul.f32 %v289_v20, %v229_v63  ;;  %v254_v24 = vmul.f32 %v253_v14, %v253_v14 }
 0x17a   :  { %139 = vmax.xlane.f32.xlu0 %v138_v60 }
 0x17b   :  { %v291_v18 = vsel %vm285_vm9, %v290_v23, 0.0  ;;  %v255_v26 = vsel %vm41_vm2, %v254_v24, 0.0 }
 0x17c   :  { %v292_v25 = vmul.f32 %v291_v18, %v251_v17 }
 0x17e   :  { %203 = vadd.xlane.f32.xlu0 %v202_v61  ;;  %v293_v27 = vsel %vm41_vm2, %v292_v25, 0.0 }
 0x1a7   :  { %v163_v28 = vpop.xlane.xlu1 %162 }
 0x1a8   :  { %v164_v30 = vrot.slane %v163_v28, 4 }
 0x1aa   :  { %v165_v32 = vadd.f32 %v164_v30, %v163_v28 }
 0x1ac   :  { %v166_v37 = vrot.slane %v165_v32, 2 }
 0x1ae   :  { %v167_v43 = vadd.f32 %v166_v37, %v165_v32 }
 0x1b0   :  { %v168_v52 = vrot.slane %v167_v43, 1 }
 0x1b2   :  { %v169_v62 = vadd.f32 %v168_v52, %v167_v43 }
 0x203   :  { %v197_v8 = vpop.xlane.xlu0 %196 }
 0x204   :  { %v198_v10 = vsub.f32 %v189_v6, %v197_v8 }
 0x206   :  { %v199_v13 = vsel %vm177_vm7, %v198_v10, 0.0 }
 0x207   :  { %v213_v16 = vsel %vm141_vm8, %v199_v13, 0.0  ;;  %v140_v19 = vpop.xlane.xlu0 %139 }
 0x208   :  { %214 = vadd.xlane.f32.xlu0 %v213_v16  ;;  %v142_v21 = vsel %vm141_vm8, %v140_v19, 0.0 }
 0x20b   :  { %v204_v29 = vpop.xlane.xlu0 %203 }
 0x20c   :  { %143 = vadd.xlane.f32.xlu0 %v142_v21  ;;  %v205_v31 = vrot.slane %v204_v29, 4 }
 0x20e   :  { %v206_v34 = vadd.f32 %v205_v31, %v204_v29 }
 0x210   :  { %236 = vadd.xlane.f32.xlu0 %v235_v22  ;;  %v207_v39 = vrot.slane %v206_v34, 2 }
 0x212   :  { %v208_v47 = vadd.f32 %v207_v39, %v206_v34 }
 0x214   :  { %256 = vadd.xlane.f32.xlu0 %v255_v26  ;;  %v209_v56 = vrot.slane %v208_v47, 1 }
 0x216   :  { %v210_v1 = vadd.f32 %v209_v56, %v208_v47 }
 0x218   :  { %294 = vadd.xlane.f32.xlu0 %v293_v27 }
 0x295   :  { %v215_v33 = vpop.xlane.xlu0 %214 }
 0x296   :  { %v216_v35 = vrot.slane %v215_v33, 4 }
 0x298   :  { %v217_v36 = vadd.f32 %v216_v35, %v215_v33 }
 0x299   :  { %v144_v38 = vpop.xlane.xlu0 %143 }
 0x29a   :  { %v145_v40 = vrot.slane %v144_v38, 4  ;;  %v218_v41 = vrot.slane %v217_v36, 2 }
 0x29c   :  { %v146_v42 = vadd.f32 %v145_v40, %v144_v38  ;;  %v219_v48 = vadd.f32 %v218_v41, %v217_v36 }
 0x29d   :  { %v237_v44 = vpop.xlane.xlu0 %236 }
 0x29e   :  { %v147_v45 = vrot.slane %v146_v42, 2  ;;  %v238_v46 = vrot.slane %v237_v44, 4  ;;  %v220_v57 = vrot.slane %v219_v48, 1 }
 0x2a0   :  { %v239_v49 = vadd.f32 %v238_v46, %v237_v44  ;;  %v148_v50 = vadd.f32 %v147_v45, %v146_v42  ;;  %v221_v3 = vadd.f32 %v220_v57, %v219_v48 }
 0x2a1   :  { %v257_v51 = vpop.xlane.xlu0 %256 }
 0x2a2   :  { %v240_v53 = vrot.slane %v239_v49, 2  ;;  %v258_v54 = vrot.slane %v257_v51, 4  ;;  %v149_v55 = vrot.slane %v148_v50, 1 }
 0x2a4   :  { %v259_v58 = vadd.f32 %v258_v54, %v257_v51  ;;  %v150_v59 = vadd.f32 %v149_v55, %v148_v50  ;;  %v241_v60 = vadd.f32 %v240_v53, %v239_v49 }
 0x2a5   :  { %v295_v61 = vpop.xlane.xlu0 %294 }
 0x2a6   :  { %v260_v63 = vrot.slane %v259_v58, 2  ;;  %v296_v0 = vrot.slane %v295_v61, 4  ;;  %389 = vpush %v150_v59  ;;  %v242_v2 = vrot.slane %v241_v60, 1 }
 0x2a7   :  { %391 = vpush %v169_v62 }
 0x2a8   :  { %v297_v4 = vadd.f32 %v296_v0, %v295_v61  ;;  %393 = vpush %v210_v1  ;;  %v243_v5 = vadd.f32 %v242_v2, %v241_v60  ;;  %v261_v6 = vadd.f32 %v260_v63, %v259_v58 }
 0x2a9   :  { %395 = vpush %v221_v3 }
 0x2aa   :  { %v298_v7 = vrot.slane %v297_v4, 2  ;;  %397 = vpush %v243_v5  ;;  %v262_v8 = vrot.slane %v261_v6, 1 }
 0x2ac   :  { %v299_v9 = vadd.f32 %v298_v7, %v297_v4  ;;  %v263_v10 = vadd.f32 %v262_v8, %v261_v6 }
 0x2ae   :  { %399 = vpush %v263_v10  ;;  %v300_v11 = vrot.slane %v299_v9, 1 }
 0x2b0   :  { %v301_v12 = vadd.f32 %v300_v11, %v299_v9 }
 0x2b2   :  { %401 = vpush %v301_v12 }
 0x2d7   :  { %s390_s4 = spop %389 }
 0x2d8   :  { %v152_v13 = vstv %s390_s4  ;;  %s392_s15 = spop %391 }
 0x2d9   :  { %v171_v15 = vstv %s392_s15  ;;  %s661_s16 = spop %393 }
 0x2da   :  { %v172_v16 = vadd.f32 %v171_v15, %v152_v13  ;;  %v212_v17 = vstv %s661_s16  ;;  %s396_s17 = spop %395 }
 0x2db   :  { %423 = vrcp.f32 %v212_v17  ;;  %s398_s18 = spop %397 }
 0x2dc   :  { %v245_v19 = vstv %s398_s18  ;;  %174 = vst.msk [vmem:[#allocation2] sm:$0x1] %vm173_vm11, %v172_v16 }
 0x2dd   :  { %v266_v20 = vmul.f32 32.0, %v245_v19  ;;  %425 = vrcp.f32 %v245_v19 }
 0x2de   :  { %440 = shalt.err (!%p437_p4)
}
 0x2df   :  { %s441_s23 = scalar_lea.hbm %s741_s8, 16 }
 0x2e0   :  { %p442_p5 = scmp.ne.s32.totalorder %s741_s8, %s441_s23  ;;  %p445_p6 = scmp.lt.u32.totalorder %s441_s23, %s741_s8 }
 0x2e2   :  { %p447_p7 = pnand %p445_p6, %p442_p5 }
 0x2e4   :  { %450 = shalt.err (!%p447_p7)
}
 0x2e5   :  { %318 = dma.vmem_to_hbm [thread:$0]  %s316_s14, 16, %s741_s8, [#allocation3]   ;;  %427 = vrcp.f32 %v266_v20  ;;  %v424_v14 = vpop.eup %423  ;;  %v223_v21 = vstv %s396_s17  ;;  %vm224_vm12 = vcmp.gt.f32.partialorder %v212_v17, 0.0  ;;  %vm304_vm13 = vcmp.gt.f32.partialorder %v245_v19, 0.0 }
 0x2e6   :  { %s400_s29 = spop %399  ;;  %s528_s2 = smov [#allocation4]   ;;  %v226_v22 = vmul.f32 %v424_v14, %v223_v21 }
 0x2e7   :  { %s402_s0 = spop %401  ;;  %s325_s5 = sshll.u32 %s528_s2, 4  ;;  %v426_v23 = vpop.eup %425  ;;  %v265_v27 = vstv %s400_s29  ;;  %s326_s5 = int_to_ptr.vmem [resolvable:$true] %s325_s5 }
 0x2e8   :  { %s529_s30 = smov [#allocation7]   ;;  %v303_v24 = vstv %s402_s0  ;;  %v227_v25 = vsel %vm224_vm12, %v226_v22, 0.0  ;;  %s530_s7 = smov [#allocation6]  }
 0x2e9   :  { %s345_s3 = sshll.u32 %s529_s30, 4  ;;  %v306_v18 = vmul.f32 %v426_v23, %v303_v24  ;;  %s335_s12 = sshll.u32 %s530_s7, 4  ;;  %228 = vst.msk [vmem:[#allocation4] sm:$0x1] %vm173_vm11, %v227_v25  ;;  %s678_s3 = int_to_ptr.vmem [resolvable:$true] %s345_s3  ;;  %s693_s12 = int_to_ptr.vmem [resolvable:$true] %s335_s12 }
 0x2ea   :  { %s451_s8 = scalar_lea.vmem %s326_s5, 16  ;;  %s455_s13 = scalar_lea.vmem %s326_s5, 32 }
 0x2eb   :  { %p452_p8 = scmp.ne.s32.totalorder %s326_s5, %s451_s8  ;;  %p456_p9 = scmp.lt.s32.totalorder %s326_s5, %s326_s5 }
 0x2ec   :  { %p457_p10 = scmp.lt.s32.totalorder %s455_s13, %s451_s8 }
 0x2ee   :  { %p458_p11 = por %p457_p10, %p456_p9 }
 0x2ef   :  { %v428_v26 = vpop.eup %427 }
 0x2f0   :  { %v269_v28 = vmul.f32 %v428_v26, %v265_v27  ;;  %p459_p12 = pnand %p458_p11, %p452_p8 }
 0x2f2   :  { %462 = shalt.err (!%p459_p12)
}
 0x2f3   :  { %s463_s14 = scalar_lea.hbm %s742_s9, 16 }
 0x2f4   :  { %p464_p13 = scmp.ne.s32.totalorder %s742_s9, %s463_s14  ;;  %p467_p0 = scmp.lt.u32.totalorder %s463_s14, %s742_s9 }
 0x2f6   :  { %p469_p1 = pnand %p467_p0, %p464_p13 }
 0x2f8   :  { %472 = shalt.err (!%p469_p1)
}
 0x2f9   :  { %328 = dma.vmem_to_hbm [thread:$0]  %s326_s5, 16, %s742_s9, [#allocation5]   ;;  %v307_v29 = vsel %vm304_vm13, %v306_v18, 0.0  ;;  %vm267_vm14 = vcmp.gt.f32.partialorder %v266_v20, 0.0 }
 0x2fa   :  { %308 = vst.msk [vmem:[#allocation7] sm:$0x1] %vm173_vm11, %v307_v29  ;;  %v270_v30 = vsel %vm267_vm14, %v269_v28, 0.0  ;;  %s473_s21 = scalar_lea.vmem %s678_s3, 16  ;;  %s477_s22 = scalar_lea.vmem %s678_s3, 32 }
 0x2fb   :  { %p474_p2 = scmp.ne.s32.totalorder %s678_s3, %s473_s21  ;;  %p478_p3 = scmp.lt.s32.totalorder %s678_s3, %s678_s3 }
 0x2fc   :  { %p479_p4 = scmp.lt.s32.totalorder %s477_s22, %s473_s21 }
 0x2fe   :  { %p480_p5 = por %p479_p4, %p478_p3 }
 0x300   :  { %p481_p6 = pnand %p480_p5, %p474_p2 }
 0x302   :  { %484 = shalt.err (!%p481_p6)
}
 0x303   :  { %s485_s9 = scalar_lea.hbm %s744_s11, 16 }
 0x304   :  { %p486_p7 = scmp.ne.s32.totalorder %s744_s11, %s485_s9  ;;  %p489_p8 = scmp.lt.u32.totalorder %s485_s9, %s744_s11 }
 0x306   :  { %p491_p9 = pnand %p489_p8, %p486_p7 }
 0x308   :  { %494 = shalt.err (!%p491_p9)
}
 0x309   :  { %348 = dma.vmem_to_hbm [thread:$0]  %s678_s3, 16, %s744_s11, [#allocation8]   ;;  %271 = vst.msk [vmem:[#allocation6] sm:$0x1] %vm173_vm11, %v270_v30 }
 0x30a   :  { %s495_s0 = scalar_lea.vmem %s693_s12, 16  ;;  %s499_s2 = scalar_lea.vmem %s693_s12, 32 }
 0x30b   :  { %p496_p10 = scmp.ne.s32.totalorder %s693_s12, %s495_s0  ;;  %p500_p11 = scmp.lt.s32.totalorder %s693_s12, %s693_s12 }
 0x30c   :  { %p501_p12 = scmp.lt.s32.totalorder %s499_s2, %s495_s0 }
 0x30e   :  { %p502_p13 = por %p501_p12, %p500_p11 }
 0x310   :  { %p503_p0 = pnand %p502_p13, %p496_p10 }
 0x312   :  { %506 = shalt.err (!%p503_p0)
}
 0x313   :  { %s507_s7 = scalar_lea.hbm %s743_s10, 16 }
 0x314   :  { %p508_p1 = scmp.ne.s32.totalorder %s743_s10, %s507_s7  ;;  %p511_p2 = scmp.lt.u32.totalorder %s507_s7, %s743_s10 }
 0x316   :  { %p513_p3 = pnand %p511_p2, %p508_p1 }
 0x318   :  { %516 = shalt.err (!%p513_p3)
}
 0x319   :  { %338 = dma.vmem_to_hbm [thread:$0]  %s693_s12, 16, %s743_s10, [#allocation5]  }
 0x31a   :  { %517 = dma.done.wait [#allocation3], 16  }
 0x31b   :  { %518 = vsyncadd [#allocation3], 4294967280 }
 0x31c   :  { %519 = dma.done.wait [#allocation5], 32  }
 0x31d   :  { %520 = vsyncadd [#allocation5], 4294967264 }
 0x31e   :  { %521 = dma.done.wait [#allocation8], 16  }
 0x31f   :  { %522 = vsyncadd [#allocation8], 4294967280 }
 0x320   :  { %361 = vsyncpa [#allocation3], 1 }
 0x321   :  { %362 = vsyncpa [#allocation5], 1 }
 0x322   :  { %363 = vsyncpa [#allocation8], 1 }

</bundles_post_ra>
